<compile_context>
chip_gen: v5e
topology: v5e:2x2
jax: 0.10.0
libtpu: 0.0.40
codegen_flags: <defaults>
</compile_context>

<pallas_src>
import jax
import jax.numpy as jnp
from jax import lax
from jax.experimental import pallas as pl
from jax.experimental.pallas import tpu as pltpu

INPUT_SIZE = 64      # D
HIDDEN = 128         # q(.) : Linear(D,128) -> ReLU -> Linear(128,128) -> Tanh
OUTPUT_CLASS = 2     # C
N_INSTANCES = 8      # N   (instances per bag in the example)
NUM_BAGS = 2         # G   (bag grid axis)
SLAB_LANES = 128     # lane-dense packed output width (>= 2*C + D)

_INV_SQRT_H = 1.0 / (float(HIDDEN) ** 0.5)


# ---------------------------------------------------------------------------
# One bag per grid step: q-MLP -> argmax gather -> softmax attention -> pool -> fcc
# ---------------------------------------------------------------------------
def _fused_kernel(c_ref, x_ref, w1_ref, b1_ref, w2_ref, b2_ref, fw_ref, fb_ref,
                  out_ref):
    x = x_ref[...]                                              # [N, D] f32 (V = Identity(feats))
    n, d = x.shape

    # ---- q(.) MLP: bf16 operands on the MXU, f32 accumulation ---------------
    h = jnp.dot(x.astype(jnp.bfloat16), w1_ref[...],
                preferred_element_type=jnp.float32) + b1_ref[...]
    h = jnp.maximum(h, 0.0)
    q = jnp.tanh(jnp.dot(h.astype(jnp.bfloat16), w2_ref[...],
                         preferred_element_type=jnp.float32) + b2_ref[...])    # [N, H] f32

    # ---- per-class argmax over instances (== torch.sort(desc)[1][0]) --------
    cs = c_ref[...]                                             # [N, C]
    ncls = cs.shape[1]
    row_ids = lax.broadcasted_iota(jnp.int32, (n, ncls), 0).astype(jnp.float32)
    col_max = jnp.max(cs, axis=0, keepdims=True)                # [1, C]
    masked = jnp.where(cs >= col_max, row_ids, float(n))        # non-max rows -> sentinel N
    arg = jnp.min(masked, axis=0, keepdims=True)                # [1, C] first-max row index
    onehot_nc = (row_ids == arg).astype(jnp.float32)            # [N, C]

    # q_max[c] = Q[idx[c]] via one-hot matmul; fold the 1/sqrt(H) scale once.
    q_max = lax.dot_general(onehot_nc, q, (((0,), (0,)), ((), ())),
                            preferred_element_type=jnp.float32) * _INV_SQRT_H  # [C, H]

    # ---- single softmax over instances; A is exactly the weights used for B -
    s_nc = lax.dot_general(q, q_max, (((1,), (1,)), ((), ())),
                           preferred_element_type=jnp.float32)  # [N, C]
    e_nc = jnp.exp(s_nc - jnp.max(s_nc, axis=0, keepdims=True))
    a_nc = e_nc * pl.reciprocal(jnp.sum(e_nc, axis=0, keepdims=True), approx=True)

    # B = A^T V (contract over the instance axis; no standalone transpose)
    b = lax.dot_general(a_nc, x, (((0,), (0,)), ((), ())),
                        preferred_element_type=jnp.float32)     # [C, D]

    # ---- fcc = Conv1d(C, C, kernel=D) as ONE dot: [1, C*D] x [C*D, C] -------
    b_flat = jnp.concatenate([b[ci:ci + 1, :] for ci in range(ncls)], axis=1)  # [1, C*D]
    c_out = jnp.dot(b_flat, fw_ref[...],
                    preferred_element_type=jnp.float32) + fb_ref[...]          # [1, C]

    # ---- pack C_out / A / B into one lane-dense [N, SLAB_LANES] slab --------
    c_rows = jnp.broadcast_to(c_out, (n, ncls))                                # row 0 is real
    b_rows = jnp.concatenate([b, jnp.zeros((n - ncls, d), jnp.float32)], axis=0)
    pieces = [a_nc, c_rows, b_rows]
    pad_w = SLAB_LANES - 2 * ncls - d
    if pad_w > 0:
        pieces.append(jnp.zeros((n, pad_w), jnp.float32))
    out_ref[...] = jnp.concatenate(pieces, axis=1)              # one unmasked [N,128] store


# ---------------------------------------------------------------------------
# Batched forward: grid over bags, weights resident in VMEM across grid steps
# ---------------------------------------------------------------------------
def bclassifier_forward_batched(feats, c, params):
    """feats: [G, N, D], c: [G, N, C] -> (C_out [G, C], A [G, N, C], B [G, C, D])."""
    g, n, d = feats.shape
    ncls = c.shape[-1]
    assert 2 * ncls + d <= SLAB_LANES

    slab = pl.pallas_call(
        _fused_kernel,
        out_shape=jax.ShapeDtypeStruct((g, n, SLAB_LANES), jnp.float32),
        grid=(g,),
        in_specs=[
            pl.BlockSpec((None, n, ncls), lambda gi: (gi, 0, 0)),        # c      (per bag)
            pl.BlockSpec((None, n, d), lambda gi: (gi, 0, 0)),           # feats  (per bag)
            pl.BlockSpec((d, HIDDEN), lambda gi: (0, 0)),                # w1     (resident)
            pl.BlockSpec((1, HIDDEN), lambda gi: (0, 0)),                # b1     (resident)
            pl.BlockSpec((HIDDEN, HIDDEN), lambda gi: (0, 0)),           # w2     (resident)
            pl.BlockSpec((1, HIDDEN), lambda gi: (0, 0)),                # b2     (resident)
            pl.BlockSpec((ncls * d, ncls), lambda gi: (0, 0)),           # fcc_w  (resident)
            pl.BlockSpec((1, ncls), lambda gi: (0, 0)),                  # fcc_b  (resident)
        ],
        out_specs=pl.BlockSpec((None, n, SLAB_LANES), lambda gi: (gi, 0, 0)),
        compiler_params=pltpu.CompilerParams(dimension_semantics=("parallel",)),
    )(c, feats,
      params["w1"], params["b1"], params["w2"], params["b2"],
      params["fcc_w"], params["fcc_b"])

    # Free layout plumbing on the packed slab.
    a = slab[:, :, :ncls]                          # [G, N, C]
    c_out = slab[:, 0, ncls:2 * ncls]              # [G, C]
    b = slab[:, :ncls, 2 * ncls:2 * ncls + d]      # [G, C, D]
    return c_out, a, b


def bclassifier_forward(feats, c, params):
    """Single-bag forward matching the PyTorch module's (C, A, B) shapes."""
    c_out, a, b = bclassifier_forward_batched(feats[None], c[None], params)
    # TODO(synk): self.modify(V, B) skipped (its submodules are undefined in the source).
    return c_out, a[0], b                          # [1, C], [N, C], [1, C, D]


# ---------------------------------------------------------------------------
# Parameter init: all layout massaging (transposes / flattening / dtypes) hoisted here
# ---------------------------------------------------------------------------
def init_params(key, d=INPUT_SIZE, hidden=HIDDEN, n_cls=OUTPUT_CLASS):
    ks = jax.random.split(key, 6)
    s = 0.1
    # torch-layout draws ...
    w1_t = s * jax.random.normal(ks[0], (hidden, d), jnp.float32)          # Linear(d,128).weight
    b1_t = s * jax.random.normal(ks[1], (hidden,), jnp.float32)
    w2_t = s * jax.random.normal(ks[2], (hidden, hidden), jnp.float32)     # Linear(128,128).weight
    b2_t = s * jax.random.normal(ks[3], (hidden,), jnp.float32)
    fcc_w_t = s * jax.random.normal(ks[4], (n_cls, n_cls, d), jnp.float32)  # Conv1d weight [Co,Ci,D]
    fcc_b_t = s * jax.random.normal(ks[5], (n_cls,), jnp.float32)
    # ... converted once to the kernel's layouts
    return {
        "w1": w1_t.T.astype(jnp.bfloat16),                 # [D, H]  bf16 (MXU-native)
        "b1": b1_t.reshape(1, hidden),                     # [1, H]  f32
        "w2": w2_t.T.astype(jnp.bfloat16),                 # [H, H]  bf16
        "b2": b2_t.reshape(1, hidden),                     # [1, H]  f32
        "fcc_w": fcc_w_t.reshape(n_cls, n_cls * d).T,      # [C_in*D, C_out] f32
        "fcc_b": fcc_b_t.reshape(1, n_cls),                # [1, C]  f32
    }


# ---------------------------------------------------------------------------
# Pure-JAX reference (mirrors the PyTorch forward, v = Identity, no modify)
# ---------------------------------------------------------------------------
def _reference(feats, c, params):
    w1 = params["w1"].astype(jnp.float32)
    w2 = params["w2"].astype(jnp.float32)
    q = jnp.tanh(jnp.maximum(feats @ w1 + params["b1"], 0.0) @ w2 + params["b2"])
    idx = jnp.argmax(c, axis=0)
    q_max = q[idx]
    scores = (q @ q_max.T) / jnp.sqrt(jnp.float32(HIDDEN))
    a = jax.nn.softmax(scores, axis=0)
    b = a.T @ feats
    c_out = b.reshape(1, -1) @ params["fcc_w"] + params["fcc_b"]
    return c_out, a, b.reshape(1, OUTPUT_CLASS, -1)


if __name__ == "__main__":
    key = jax.random.PRNGKey(0)
    k_feat, k_c, k_p = jax.random.split(key, 3)

    feats = jax.random.normal(k_feat, (NUM_BAGS, N_INSTANCES, INPUT_SIZE), jnp.float32)
    c = jax.random.normal(k_c, (NUM_BAGS, N_INSTANCES, OUTPUT_CLASS), jnp.float32)
    params = init_params(k_p)

    fwd = jax.jit(bclassifier_forward_batched)
    C_out, A, B = jax.block_until_ready(fwd(feats, c, params))

    assert C_out.shape == (NUM_BAGS, OUTPUT_CLASS)
    assert A.shape == (NUM_BAGS, N_INSTANCES, OUTPUT_CLASS)
    assert B.shape == (NUM_BAGS, OUTPUT_CLASS, INPUT_SIZE)

    # Also exercise the single-bag, module-shaped wrapper.
    C1, A1, B1 = jax.block_until_ready(jax.jit(bclassifier_forward)(feats[0], c[0], params))
    assert C1.shape == (1, OUTPUT_CLASS)
    assert A1.shape == (N_INSTANCES, OUTPUT_CLASS)
    assert B1.shape == (1, OUTPUT_CLASS, INPUT_SIZE)

    for g in range(NUM_BAGS):
        C_ref, A_ref, B_ref = _reference(feats[g], c[g], params)
        assert jnp.allclose(A[g], A_ref, atol=2e-2, rtol=2e-2)
        assert jnp.allclose(B[g], B_ref[0], atol=2e-2, rtol=2e-2)
        assert jnp.allclose(C_out[g], C_ref[0], atol=2e-2, rtol=2e-2)
    # softmax over instances sums to ~1 per class (approx reciprocal tolerance)
    assert jnp.allclose(jnp.sum(A, axis=1),
                        jnp.ones((NUM_BAGS, OUTPUT_CLASS)), atol=1e-2)

    print("KERNEL_OK")
</pallas_src>

<mosaic_0001>
module attributes {stable_mosaic.version = 11 : i64} {
  func.func @_fused_kernel(%arg0: i32, %arg1: memref<1x8x2xf32, #tpu.memory_space<vmem>>, %arg2: memref<1x8x64xf32, #tpu.memory_space<vmem>>, %arg3: memref<64x128xbf16, #tpu.memory_space<vmem>>, %arg4: memref<1x128xf32, #tpu.memory_space<vmem>>, %arg5: memref<128x128xbf16, #tpu.memory_space<vmem>>, %arg6: memref<1x128xf32, #tpu.memory_space<vmem>>, %arg7: memref<128x2xf32, #tpu.memory_space<vmem>>, %arg8: memref<1x2xf32, #tpu.memory_space<vmem>>, %arg9: memref<1x8x128xf32, #tpu.memory_space<vmem>>) attributes {dimension_semantics = [#tpu.dimension_semantics<parallel>], iteration_bounds = array<i64: 2>, scalar_prefetch = 0 : i64, scratch_operands = 0 : i64, tpu.core_type = #tpu.core_type<tc>, window_params = [{transform_indices = @transform_0, window_bounds = array<i64: 1, 8, 2>}, {transform_indices = @transform_1, window_bounds = array<i64: 1, 8, 64>}, {pipeline_mode = #tpu.pipeline_mode<synchronous>, transform_indices = @transform_2, window_bounds = array<i64: 64, 128>}, {pipeline_mode = #tpu.pipeline_mode<synchronous>, transform_indices = @transform_3, window_bounds = array<i64: 1, 128>}, {pipeline_mode = #tpu.pipeline_mode<synchronous>, transform_indices = @transform_4, window_bounds = array<i64: 128, 128>}, {pipeline_mode = #tpu.pipeline_mode<synchronous>, transform_indices = @transform_5, window_bounds = array<i64: 1, 128>}, {pipeline_mode = #tpu.pipeline_mode<synchronous>, transform_indices = @transform_6, window_bounds = array<i64: 128, 2>}, {pipeline_mode = #tpu.pipeline_mode<synchronous>, transform_indices = @transform_7, window_bounds = array<i64: 1, 2>}, {transform_indices = @transform_8, window_bounds = array<i64: 1, 8, 128>}]} {
    %c0 = arith.constant 0 : index
    %c0_0 = arith.constant 0 : index
    %c0_1 = arith.constant 0 : index
    %0 = vector.load %arg2[%c0, %c0_0, %c0_1] : memref<1x8x64xf32, #tpu.memory_space<vmem>>, vector<1x8x64xf32>
    %1 = vector.shape_cast %0 : vector<1x8x64xf32> to vector<8x64xf32>
    %2 = arith.truncf %1 : vector<8x64xf32> to vector<8x64xbf16>
    %c0_2 = arith.constant 0 : index
    %c0_3 = arith.constant 0 : index
    %3 = vector.load %arg3[%c0_2, %c0_3] : memref<64x128xbf16, #tpu.memory_space<vmem>>, vector<64x128xbf16>
    %cst = arith.constant dense<0.000000e+00> : vector<8x128xf32>
    %4 = tpu.matmul %2, %3, %cst {dimension_numbers = #tpu.dot_dimension_numbers<[1], [0], [0], [1], [0, 0, 1, 1], [], []>} : vector<8x64xbf16>, vector<64x128xbf16>, vector<8x128xf32> -> vector<8x128xf32>
    %c0_4 = arith.constant 0 : index
    %c0_5 = arith.constant 0 : index
    %5 = vector.load %arg4[%c0_4, %c0_5] : memref<1x128xf32, #tpu.memory_space<vmem>>, vector<1x128xf32>
    %6 = vector.broadcast %5 : vector<1x128xf32> to vector<8x128xf32>
    %7 = arith.addf %4, %6 : vector<8x128xf32>
    %cst_6 = arith.constant 0.000000e+00 : f32
    %8 = vector.broadcast %cst_6 : f32 to vector<8x128xf32>
    %9 = arith.maximumf %7, %8 : vector<8x128xf32>
    %10 = arith.truncf %9 : vector<8x128xf32> to vector<8x128xbf16>
    %c0_7 = arith.constant 0 : index
    %c0_8 = arith.constant 0 : index
    %11 = vector.load %arg5[%c0_7, %c0_8] : memref<128x128xbf16, #tpu.memory_space<vmem>>, vector<128x128xbf16>
    %cst_9 = arith.constant dense<0.000000e+00> : vector<8x128xf32>
    %12 = tpu.matmul %10, %11, %cst_9 {dimension_numbers = #tpu.dot_dimension_numbers<[1], [0], [0], [1], [0, 0, 1, 1], [], []>} : vector<8x128xbf16>, vector<128x128xbf16>, vector<8x128xf32> -> vector<8x128xf32>
    %c0_10 = arith.constant 0 : index
    %c0_11 = arith.constant 0 : index
    %13 = vector.load %arg6[%c0_10, %c0_11] : memref<1x128xf32, #tpu.memory_space<vmem>>, vector<1x128xf32>
    %14 = vector.broadcast %13 : vector<1x128xf32> to vector<8x128xf32>
    %15 = arith.addf %12, %14 : vector<8x128xf32>
    %16 = math.tanh %15 : vector<8x128xf32>
    %c0_12 = arith.constant 0 : index
    %c0_13 = arith.constant 0 : index
    %c0_14 = arith.constant 0 : index
    %17 = vector.load %arg1[%c0_12, %c0_13, %c0_14] : memref<1x8x2xf32, #tpu.memory_space<vmem>>, vector<1x8x2xf32>
    %18 = vector.shape_cast %17 : vector<1x8x2xf32> to vector<8x2xf32>
    %19 = tpu.iota {dimensions = array<i32: 0>} : vector<8x2xi32>
    %20 = arith.sitofp %19 : vector<8x2xi32> to vector<8x2xf32>
    %cst_15 = arith.constant dense<0xFF800000> : vector<2xf32>
    %21 = vector.multi_reduction <maximumf>, %18, %cst_15 [0] : vector<8x2xf32> to vector<2xf32>
    %22 = vector.shape_cast %21 : vector<2xf32> to vector<1x2xf32>
    %23 = vector.broadcast %22 : vector<1x2xf32> to vector<8x2xf32>
    %24 = arith.cmpf oge, %18, %23 : vector<8x2xf32>
    %cst_16 = arith.constant 8.000000e+00 : f32
    %25 = vector.broadcast %cst_16 : f32 to vector<8x2xf32>
    %26 = arith.select %24, %20, %25 : vector<8x2xi1>, vector<8x2xf32>
    %cst_17 = arith.constant dense<0x7F800000> : vector<2xf32>
    %27 = vector.multi_reduction <minimumf>, %26, %cst_17 [0] : vector<8x2xf32> to vector<2xf32>
    %28 = vector.shape_cast %27 : vector<2xf32> to vector<1x2xf32>
    %29 = vector.broadcast %28 : vector<1x2xf32> to vector<8x2xf32>
    %30 = arith.cmpf oeq, %20, %29 : vector<8x2xf32>
    %31 = arith.extui %30 : vector<8x2xi1> to vector<8x2xi32>
    %32 = arith.sitofp %31 : vector<8x2xi32> to vector<8x2xf32>
    %cst_18 = arith.constant dense<0.000000e+00> : vector<2x128xf32>
    %33 = tpu.matmul %32, %16, %cst_18 {dimension_numbers = #tpu.dot_dimension_numbers<[0], [0], [1], [1], [0, 1, 1, 1], [], []>} : vector<8x2xf32>, vector<8x128xf32>, vector<2x128xf32> -> vector<2x128xf32>
    %cst_19 = arith.constant 0.0883883461 : f32
    %34 = vector.broadcast %cst_19 : f32 to vector<2x128xf32>
    %35 = arith.mulf %33, %34 : vector<2x128xf32>
    %cst_20 = arith.constant dense<0.000000e+00> : vector<8x2xf32>
    %36 = tpu.matmul %16, %35, %cst_20 {dimension_numbers = #tpu.dot_dimension_numbers<[1], [1], [0], [0], [0, 0, 1, 0], [], []>} : vector<8x128xf32>, vector<2x128xf32>, vector<8x2xf32> -> vector<8x2xf32>
    %cst_21 = arith.constant dense<0xFF800000> : vector<2xf32>
    %37 = vector.multi_reduction <maximumf>, %36, %cst_21 [0] : vector<8x2xf32> to vector<2xf32>
    %38 = vector.shape_cast %37 : vector<2xf32> to vector<1x2xf32>
    %39 = vector.broadcast %38 : vector<1x2xf32> to vector<8x2xf32>
    %40 = arith.subf %36, %39 : vector<8x2xf32>
    %41 = math.exp %40 : vector<8x2xf32>
    %cst_22 = arith.constant dense<0.000000e+00> : vector<2xf32>
    %42 = vector.multi_reduction <add>, %41, %cst_22 [0] : vector<8x2xf32> to vector<2xf32>
    %43 = vector.shape_cast %42 : vector<2xf32> to vector<1x2xf32>
    %44 = tpu.reciprocal %43 {approx = true} : vector<1x2xf32> -> vector<1x2xf32>
    %45 = vector.broadcast %44 : vector<1x2xf32> to vector<8x2xf32>
    %46 = arith.mulf %41, %45 : vector<8x2xf32>
    %cst_23 = arith.constant dense<0.000000e+00> : vector<2x64xf32>
    %47 = tpu.matmul %46, %1, %cst_23 {dimension_numbers = #tpu.dot_dimension_numbers<[0], [0], [1], [1], [0, 1, 1, 1], [], []>} : vector<8x2xf32>, vector<8x64xf32>, vector<2x64xf32> -> vector<2x64xf32>
    %48 = vector.extract_strided_slice %47 {offsets = [0, 0], sizes = [1, 64], strides = [1, 1]} : vector<2x64xf32> to vector<1x64xf32>
    %49 = vector.extract_strided_slice %47 {offsets = [1, 0], sizes = [1, 64], strides = [1, 1]} : vector<2x64xf32> to vector<1x64xf32>
    %50 = tpu.concatenate %48, %49 in 1 : vector<1x64xf32>, vector<1x64xf32> -> vector<1x128xf32>
    %c0_24 = arith.constant 0 : index
    %c0_25 = arith.constant 0 : index
    %51 = vector.load %arg7[%c0_24, %c0_25] : memref<128x2xf32, #tpu.memory_space<vmem>>, vector<128x2xf32>
    %cst_26 = arith.constant dense<0.000000e+00> : vector<1x2xf32>
    %52 = tpu.matmul %50, %51, %cst_26 {dimension_numbers = #tpu.dot_dimension_numbers<[1], [0], [0], [1], [0, 0, 1, 1], [], []>} : vector<1x128xf32>, vector<128x2xf32>, vector<1x2xf32> -> vector<1x2xf32>
    %c0_27 = arith.constant 0 : index
    %c0_28 = arith.constant 0 : index
    %53 = vector.load %arg8[%c0_27, %c0_28] : memref<1x2xf32, #tpu.memory_space<vmem>>, vector<1x2xf32>
    %54 = arith.addf %52, %53 : vector<1x2xf32>
    %55 = vector.shape_cast %54 : vector<1x2xf32> to vector<1x2xf32>
    %56 = vector.broadcast %55 : vector<1x2xf32> to vector<8x2xf32>
    %cst_29 = arith.constant 0.000000e+00 : f32
    %57 = vector.broadcast %cst_29 : f32 to vector<6x64xf32>
    %58 = tpu.concatenate %47, %57 in 0 : vector<2x64xf32>, vector<6x64xf32> -> vector<8x64xf32>
    %cst_30 = arith.constant 0.000000e+00 : f32
    %59 = vector.broadcast %cst_30 : f32 to vector<8x60xf32>
    %60 = tpu.concatenate %46, %56, %58, %59 in 1 : vector<8x2xf32>, vector<8x2xf32>, vector<8x64xf32>, vector<8x60xf32> -> vector<8x128xf32>
    %c0_31 = arith.constant 0 : index
    %c0_32 = arith.constant 0 : index
    %c0_33 = arith.constant 0 : index
    %61 = vector.load %arg9[%c0_31, %c0_32, %c0_33] : memref<1x8x128xf32, #tpu.memory_space<vmem>>, vector<1x8x128xf32>
    %62 = vector.shape_cast %61 : vector<1x8x128xf32> to vector<8x128xf32>
    %63 = vector.shape_cast %60 : vector<8x128xf32> to vector<1x8x128xf32>
    tpu.vector_store %arg9[%c0_31, %c0_32, %c0_33], %63 {strides = array<i32>} : memref<1x8x128xf32, #tpu.memory_space<vmem>>, vector<1x8x128xf32>,
    return
  }
  func.func @transform_0(%arg0: i32) -> (i32, i32, i32) {
    %c0_i32 = arith.constant 0 : i32
    %c0_i32_0 = arith.constant 0 : i32
    %c0_i32_1 = arith.constant 0 : i32
    return %arg0, %c0_i32, %c0_i32_0 : i32, i32, i32
  }
  func.func @transform_1(%arg0: i32) -> (i32, i32, i32) {
    %c0_i32 = arith.constant 0 : i32
    %c0_i32_0 = arith.constant 0 : i32
    %c0_i32_1 = arith.constant 0 : i32
    return %arg0, %c0_i32, %c0_i32_0 : i32, i32, i32
  }
  func.func @transform_2(%arg0: i32) -> (i32, i32) {
    %c0_i32 = arith.constant 0 : i32
    %c0_i32_0 = arith.constant 0 : i32
    %c0_i32_1 = arith.constant 0 : i32
    return %c0_i32, %c0_i32_0 : i32, i32
  }
  func.func @transform_3(%arg0: i32) -> (i32, i32) {
    %c0_i32 = arith.constant 0 : i32
    %c0_i32_0 = arith.constant 0 : i32
    %c0_i32_1 = arith.constant 0 : i32
    return %c0_i32, %c0_i32_0 : i32, i32
  }
  func.func @transform_4(%arg0: i32) -> (i32, i32) {
    %c0_i32 = arith.constant 0 : i32
    %c0_i32_0 = arith.constant 0 : i32
    %c0_i32_1 = arith.constant 0 : i32
    return %c0_i32, %c0_i32_0 : i32, i32
  }
  func.func @transform_5(%arg0: i32) -> (i32, i32) {
    %c0_i32 = arith.constant 0 : i32
    %c0_i32_0 = arith.constant 0 : i32
    %c0_i32_1 = arith.constant 0 : i32
    return %c0_i32, %c0_i32_0 : i32, i32
  }
  func.func @transform_6(%arg0: i32) -> (i32, i32) {
    %c0_i32 = arith.constant 0 : i32
    %c0_i32_0 = arith.constant 0 : i32
    %c0_i32_1 = arith.constant 0 : i32
    return %c0_i32, %c0_i32_0 : i32, i32
  }
  func.func @transform_7(%arg0: i32) -> (i32, i32) {
    %c0_i32 = arith.constant 0 : i32
    %c0_i32_0 = arith.constant 0 : i32
    %c0_i32_1 = arith.constant 0 : i32
    return %c0_i32, %c0_i32_0 : i32, i32
  }
  func.func @transform_8(%arg0: i32) -> (i32, i32, i32) {
    %c0_i32 = arith.constant 0 : i32
    %c0_i32_0 = arith.constant 0 : i32
    %c0_i32_1 = arith.constant 0 : i32
    return %arg0, %c0_i32, %c0_i32_0 : i32, i32, i32
  }
}

</mosaic_0001>

<bundles_post_ra>
// kernel: bclassifier_forward_batched.1
= control target key start
LH: loop header
LB: loop body
LE: loop exit
PB: predicated region body
PF: predicated region fallthrough
CT: control target
= control target key end

     0   :  { %s909_s27 = smov 0   ;;  %s1036_s0 = inlined_call_operand.vmem [shape: f32[2,8,2], index: 0, kind: input, shape index: {}]   ;;  %s1037_s1 = inlined_call_operand.vmem [shape: f32[2,8,64], index: 1, kind: input, shape index: {}]   ;;  %s1038_s2 = inlined_call_operand.vmem [shape: bf16[64,128], index: 2, kind: input, shape index: {}]   ;;  %s1039_s3 = inlined_call_operand.vmem [shape: f32[1,128], index: 3, kind: input, shape index: {}]   ;;  %s1040_s4 = inlined_call_operand.vmem [shape: bf16[128,128], index: 4, kind: input, shape index: {}]   ;;  %s1041_s5 = inlined_call_operand.vmem [shape: f32[1,128], index: 5, kind: input, shape index: {}]   ;;  %s1042_s6 = inlined_call_operand.vmem [shape: f32[128,2], index: 6, kind: input, shape index: {}]   ;;  %s1043_s7 = inlined_call_operand.vmem [shape: f32[1,2], index: 7, kind: input, shape index: {}]   ;;  %s1044_s8 = inlined_call_operand.vmem [shape: f32[2,8,128], index: 8, kind: output, shape index: {}]  }
   0x1 LB: > { %s758_s28 = sadd.s32 4294967295, %s858_s27   ;;  %p762_p0 = scmp.ge.s32.totalorder %s858_s27, 1  ;;  %s858_s27 = sphi %s909_s27, %s18_s27  }
   0x2   : > { %p270_p1 = scmp.lt.s32.totalorder %s858_s27, 3 }
   0x4   : > { %p271_p2 = pnand %p762_p0, %p270_p1 }
   0x5   : > { %p306_p3 = scmp.lt.s32.totalorder (!%p271_p2), %s758_s28, 1  ;;  %s861_s29 = smov (!%p271_p2), 4  }
   0x6   : > { %274 = sbr.rel (%p271_p2) target bundleno = 1280 (0x500), region = 52  ;;  %s862_s30 = smov (!%p271_p2), 64  }
   0x7   : > { %s863_s18 = smov (!%p271_p2), 2  }
   0xb   : > { %v823_v0 = vld [vmem:[%s1038_s2 + $0x18] sm:$0xff]  ;;  %v822_v2 = vld [vmem:[%s1038_s2 + $0x10] sm:$0xff]  ;;  %s1046_s28 = smov (!%p306_p3, %s758_s28), 1  ;;  %vm462_vm0 = vcmask 15360   ;;  %v821_v4 = vld [vmem:[%s1038_s2 + $0x8] sm:$0xff]  ;;  %v459_v9 = vlaneseq  ;;  %vm357_vm1 = vcmask 523264  }
   0xc   : > { %v831_v1 = vld [vmem:[%s1040_s4 + $0x38] sm:$0xff]  ;;  %365 = vmatpush.bf16.msra.mxu0 %v823_v0  ;;  %s926_s13 = sshll.u32 %s1046_s28, 3  ;;  %v830_v3 = vld [vmem:[%s1040_s4 + $0x30] sm:$0xff]  ;;  %v829_v7 = vld [vmem:[%s1040_s4 + $0x28] sm:$0xff]  ;;  %v860_v31 = vmov 0.0   ;;  %vm514_vm4 = vcmask 64512  }
   0xd   : > { %444 = vmatpush.bf16.msra.mxu1 %v831_v1  ;;  %s309_s16 = scalar_lea.vmem %s1036_s0, %s926_s13  ;;  %s313_s23 = scalar_lea.vmem %s1037_s1, %s926_s13  ;;  %v820_v10 = vld [vmem:[%s1038_s2] sm:$0xff]  ;;  %v460_v16 = vshrl.u32 %v459_v9, 7  ;;  %v827_v18 = vld [vmem:[%s1040_s4 + $0x18] sm:$0xff]  ;;  %v826_v22 = vld [vmem:[%s1040_s4 + $0x10] sm:$0xff]  ;;  %vm677_vm5 = vcmask 1041408   ;;  %vm688_vm6 = vcmask 31744  }
   0xe   : > { %v458_v5 = vld [vmem:[%s309_s16] sm:$0xff]  ;;  %v825_v33 = vld [vmem:[%s1040_s4 + $0x8] sm:$0xff]  ;;  %vm690_vm7 = vcmask 556032   ;;  %s317_s21 = scalar_lea.vmem %s1044_s8, %s926_s13 }
   0xf   : > { %v463_v6 = vsel %vm462_vm0, %v458_v5, -inf  ;;  %v319_v11 = vld [vmem:[%s313_s23] sm:$0xff]  ;;  %v461_v20 = vcvt.s32.f32 %v460_v16 }
  0x10   : > { %366 = vmatpush.bf16.msra.mxu0 %v822_v2  ;;  %v464_v8 = vrot.slane %v463_v6, 4  ;;  %v828_v13 = vld [vmem:[%s1040_s4 + $0x20] sm:$0xff]  ;;  %v320_v15 = vpack.c.bf16 %v319_v11, %v319_v11 }
  0x11   : > { %445 = vmatpush.bf16.msra.mxu1 %v830_v3  ;;  %v824_v34 = vld [vmem:[%s1040_s4] sm:$0xff] }
  0x12   : > { %v465_v12 = vmax.f32 %v463_v6, %v464_v8  ;;  %v844_v35 = vld [vmem:[%s1039_s3] ss:$0 sm:$0xff]  ;;  %v654_v6 = vld [vmem:[%s1042_s6 + $0x78] sm:$0xff]  ;;  %v652_v8 = vld [vmem:[%s1042_s6 + $0x68] sm:$0xff] }
  0x13   : > { %v845_v41 = vld [vmem:[%s1041_s5] ss:$0 sm:$0xff] }
  0x14   : > { %367 = vmatpush.bf16.msra.mxu0 %v821_v4  ;;  %v466_v14 = vrot.slane %v465_v12, 2  ;;  %v647_v16 = vld [vmem:[%s1042_s6 + $0x40] sm:$0xff] }
  0x15   : > { %446 = vmatpush.bf16.msra.mxu1 %v829_v7  ;;  %v653_v7 = vld [vmem:[%s1042_s6 + $0x70] sm:$0xff] }
  0x16   : > { %v467_v17 = vmax.f32 %v465_v12, %v466_v14  ;;  %v651_v12 = vld [vmem:[%s1042_s6 + $0x60] sm:$0xff]  ;;  %v649_v14 = vld [vmem:[%s1042_s6 + $0x50] sm:$0xff] }
  0x18   : > { %368 = vmatpush.bf16.msra.mxu0 %v820_v10  ;;  %v468_v19 = vrot.slane %v467_v17, 1 }
  0x19   : > { %447 = vmatpush.bf16.msra.mxu1 %v828_v13  ;;  %v650_v13 = vld [vmem:[%s1042_s6 + $0x58] sm:$0xff] }
  0x1a   : > { %v469_v21 = vmax.f32 %v467_v17, %v468_v19  ;;  %v646_v17 = vld [vmem:[%s1042_s6 + $0x38] sm:$0xff]  ;;  %v644_v19 = vld [vmem:[%s1042_s6 + $0x28] sm:$0xff] }
  0x1b   : > { %782 = vmatmul.msk.bf16.vlgmr.msra.gmra.mxu0 %vm357_vm1, %v320_v15  ;;  %v648_v15 = vld [vmem:[%s1042_s6 + $0x48] sm:$0xff] }
  0x1c   : > { %vm470_vm2 = vcmp.ge.f32.partialorder %v458_v5, %v469_v21  ;;  %v642_v21 = vld [vmem:[%s1042_s6 + $0x18] sm:$0xff] }
  0x1d   : > { %448 = vmatpush.bf16.msra.mxu1 %v827_v18  ;;  %v471_v23 = vsel %vm470_vm2, %v461_v20, 8.0  ;;  %v645_v18 = vld [vmem:[%s1042_s6 + $0x30] sm:$0xff] }
  0x1e   : > { %v472_v24 = vsel %vm462_vm0, %v471_v23, inf  ;;  %v640_v23 = vld [vmem:[%s1042_s6 + $0x8] sm:$0xff] }
  0x1f   : > { %v473_v25 = vrot.slane %v472_v24, 4 }
  0x21   : > { %449 = vmatpush.bf16.msra.mxu1 %v826_v22  ;;  %v474_v26 = vmin.f32 %v472_v24, %v473_v25  ;;  %v641_v22 = vld [vmem:[%s1042_s6 + $0x10] sm:$0xff]  ;;  %v639_v24 = vld [vmem:[%s1042_s6] sm:$0xff] }
  0x23   : > { %v475_v27 = vrot.slane %v474_v26, 2 }
  0x25   : > { %v476_v28 = vmin.f32 %v474_v26, %v475_v27  ;;  %450 = vmatpush.bf16.msra.mxu1 %v825_v33  ;;  %v655_v27 = vld [vmem:[%s1043_s7] sm:$0x1] }
  0x27   : > { %v477_v29 = vrot.slane %v476_v28, 1 }
  0x29   : > { %v478_v30 = vmin.f32 %v476_v28, %v477_v29  ;;  %451 = vmatpush.bf16.msra.mxu1 %v824_v34 }
  0x2b   : > { %vm479_vm3 = vcmp.eq.f32.partialorder %v461_v20, %v478_v30  ;;  %v643_v20 = vld [vmem:[%s1042_s6 + $0x20] sm:$0xff] }
  0x2c   : > { %v815_v32 = vsel %vm479_vm3, 1.0, %v860_v31 }
  0x2d   : > { %482 = vxpose.xlu0.b32.start.end [1/1] (short) (narrow) %v815_v32, 8 }
  0x98   : > { %v370_v36 = vpop.f32.mrf.mxu0 }
  0x99   : > { %v371_v37 = vadd.f32 %v844_v35, %v370_v36 }
  0x9b   : > { %v374_v38 = vmax.f32 %v371_v37, 0.0 }
  0x9d   : > { %v375_v39 = vpack.c.bf16 %v374_v38, %v374_v38 }
  0x9f   : > { %452 = vmatmul.bf16.vlgmr.msra.gmra.mxu1 %v375_v39 }
  0xa0   : > { %v372_v40 = vpop.f32.mrf.mxu0 }
  0xd1   : > { %v498_v45 = vpop.trf.xlu0 }
 0x11c   : > { %v453_v42 = vpop.f32.mrf.mxu1 }
 0x11d   : > { %v454_v43 = vadd.f32 %v845_v41, %v453_v42 }
 0x11f   : > { %846 = vtanh.f32 %v454_v43 }
 0x124   : > { %v455_v44 = vpop.f32.mrf.mxu1 }
 0x125   : > { %v847_v46 = vpop.eup %846 }
 0x126   : > { %533 = vmatpush.msra.mxu2 %v847_v46 }
 0x127   : > { %816 = vmatmul.msk.f32.vlgmr.msra.gmra.mxu2 %vm514_vm4, %v498_v45 }
 0x128   : > { %628 = vmatpush.msrb.mxu2 %v319_v11 }
 0x1aa   : > { %v535_v47 = vpop.f32.mrf.mxu2 }
 0x1ab   : > { %v538_v48 = vmul.f32 0.088388346, %v535_v47 }
 0x1ad   : > { %554 = vmatpush.xpose.msra.mxu3 %v538_v48 }
 0x1b0   : > { %555 = vmatmul.f32.vlgmr.msra.gmra.mxu3 %v847_v46 }
 0x1b1   : > { %656 = vmatpush.msrb.mxu3 %v654_v6 }
 0x1b3   : > { %657 = vmatpush.msrb.mxu3 %v653_v7 }
 0x1b5   : > { %658 = vmatpush.msrb.mxu3 %v652_v8 }
 0x1b7   : > { %659 = vmatpush.msrb.mxu3 %v651_v12 }
 0x1b9   : > { %660 = vmatpush.msrb.mxu3 %v650_v13 }
 0x1bb   : > { %661 = vmatpush.msrb.mxu3 %v649_v14 }
 0x1bd   : > { %662 = vmatpush.msrb.mxu3 %v648_v15 }
 0x1bf   : > { %663 = vmatpush.msrb.mxu3 %v647_v16 }
 0x1c1   : > { %664 = vmatpush.msrb.mxu3 %v646_v17 }
 0x1c3   : > { %665 = vmatpush.msrb.mxu3 %v645_v18 }
 0x1c5   : > { %666 = vmatpush.msrb.mxu3 %v644_v19 }
 0x1c7   : > { %667 = vmatpush.msrb.mxu3 %v643_v20 }
 0x1c9   : > { %668 = vmatpush.msrb.mxu3 %v642_v21 }
 0x1cb   : > { %669 = vmatpush.msrb.mxu3 %v641_v22 }
 0x1cd   : > { %670 = vmatpush.msrb.mxu3 %v640_v23 }
 0x1cf   : > { %671 = vmatpush.msrb.mxu3 %v639_v24 }
 0x233   : > { %v556_v49 = vpop.f32.mrf.mxu3 }
 0x234   : > { %v559_v50 = vsel %vm462_vm0, %v556_v49, -inf }
 0x235   : > { %v560_v51 = vrot.slane %v559_v50, 4 }
 0x237   : > { %v561_v52 = vmax.f32 %v559_v50, %v560_v51 }
 0x239   : > { %v562_v53 = vrot.slane %v561_v52, 2 }
 0x23b   : > { %v563_v54 = vmax.f32 %v561_v52, %v562_v53 }
 0x23d   : > { %v564_v55 = vrot.slane %v563_v54, 1 }
 0x23f   : > { %v565_v56 = vmax.f32 %v563_v54, %v564_v55 }
 0x241   : > { %v566_v57 = vsub.f32 %v556_v49, %v565_v56 }
 0x243   : > { %v567_v58 = vmul.f32 1.442695, %v566_v57 }
 0x245   : > { %848 = vpow2.f32 %v567_v58 }
 0x24b   : > { %v849_v59 = vpop.eup %848 }
 0x24c   : > { %v569_v60 = vsel %vm462_vm0, %v849_v59, 0.0 }
 0x24d   : > { %v570_v61 = vrot.slane %v569_v60, 4 }
 0x24f   : > { %v571_v62 = vadd.f32 %v570_v61, %v569_v60 }
 0x251   : > { %v572_v63 = vrot.slane %v571_v62, 2 }
 0x253   : > { %v573_v0 = vadd.f32 %v572_v63, %v571_v62 }
 0x255   : > { %v574_v1 = vrot.slane %v573_v0, 1 }
 0x257   : > { %v575_v2 = vadd.f32 %v574_v1, %v573_v0 }
 0x259   : > { %850 = vrcp.f32 %v575_v2 }
 0x25f   : > { %v851_v3 = vpop.eup %850 }
 0x260   : > { %v577_v4 = vmul.f32 %v851_v3, %v849_v59 }
 0x262   : > { %578 = vxpose.xlu0.b32.start.end [1/1] (short) (narrow) %v577_v4, 8 }
 0x306   : > { %v594_v5 = vpop.trf.xlu0 }
 0x307   : > { %817 = vmatmul.msk.f32.vlgmr.msrb.gmra.mxu2 %vm514_vm4, %v594_v5 }
 0x38a   : > { %v630_v9 = vpop.f32.mrf.mxu2 }
 0x38b   : > { %v678_v10 = vsel %vm677_vm5, %v630_v9, 0.0  ;;  %v634_v11 = vrot.slane %v630_v9, 1 }
 0x38c   : > { %684 = vrot.lane.b32.xlu2 %v678_v10, %s861_s29 }
 0x38d   : > { %635 = vrot.lane.b32.xlu1 %v634_v11, %s862_s30 }
 0x3e6   : > { %v685_v32 = vpop.permute.xlu2 %684 }
 0x3ff   : > { %v636_v25 = vpop.permute.xlu1 %635 }
 0x400   : > { %v638_v26 = vsel %vm357_vm1, %v630_v9, %v636_v25 }
 0x401   : > { %672 = vmatmul.f32.vlgmr.msrb.gmra.mxu3 %v638_v26 }
 0x484   : > { %v673_v28 = vpop.f32.mrf.mxu3 }
 0x485   : > { %v674_v29 = vadd.f32 %v673_v28, %v655_v27 }
 0x487   : > { %v676_v30 = vperm.slane %v674_v29, 0 }
 0x489   : > { %680 = vrot.lane.b32.xlu1 %v676_v30, %s863_s18 }
 0x4fb   : > { %v681_v31 = vpop.permute.xlu1 %680 }
 0x4fc   : > { %v687_v33 = vsel %vm462_vm0, %v577_v4, %v681_v31 }
 0x4fd   : > { %v689_v34 = vsel %vm688_vm6, %v687_v33, %v685_v32 }
 0x4fe   : > { %v691_v35 = vsel %vm690_vm7, %v689_v34, 0.0 }
 0x4ff   : > { %692 = vst [vmem:[%s317_s21] sm:$0xff] %v691_v35 }
 0x500 PF: > { %s18_s27 = sadd.s32 1, %s858_s27  }
 0x501   : > { %p15_p4 = scmp.ge.s32.totalorder %s18_s27, 4  }
 0x503   :  { %17 = sbr.rel (!%p15_p4) target bundleno = 1 (0x1), region = 85 }

</bundles_post_ra>
